<compile_context>
chip_gen: v6e
topology: v6e:2x2x1
jax: 0.10.0
libtpu: 0.0.40
codegen_flags: <defaults>
</compile_context>

<pallas_src>
import math
import jax
import jax.numpy as jnp
from jax.experimental import pallas as pl
from jax.experimental.pallas import tpu as pltpu


def _round_up(v, m):
    return ((v + m - 1) // m) * m


def _fused_gcn_kernel(x_ref, w_ref, adj_ref, bias_ref, o_ref, support_ref):
    # Stage 1: support = x @ W, computed once (first row-block) and kept
    # resident in VMEM scratch for every subsequent row-block.
    @pl.when(pl.program_id(0) == 0)
    def _():
        support_ref[...] = jnp.dot(
            x_ref[...], w_ref[...], preferred_element_type=jnp.float32)

    # Stage 2: one lane-dense (tm, F_out_p) output tile per grid step.
    # Full contraction dim is resident -> single jnp.dot, no accumulator
    # scratch or k-phase pl.when scaffolding needed.
    out = jnp.dot(adj_ref[...], support_ref[...],
                  preferred_element_type=jnp.float32)
    o_ref[...] = (out + bias_ref[...]).astype(o_ref.dtype)


def graph_convolution(x, adj, weight, bias, *, compute_dtype=jnp.float32,
                      block_rows=256):
    """Pallas GCN layer: adj @ (x @ weight) + bias, fused in one kernel."""
    n, f_in = x.shape
    f_out = weight.shape[1]
    assert adj.shape == (n, n)
    assert weight.shape[0] == f_in and bias.shape == (f_out,)

    # --- TPU-friendly padding -------------------------------------------
    # Lane-dense output: pad out_features to a multiple of 128.
    f_out_p = _round_up(f_out, 128)
    # Row-block size: as large as reasonable, multiple of 8 (sublane), and
    # the padded node count divides evenly by it.
    tm = min(block_rows, _round_up(n, 8))
    n_p = _round_up(n, tm)

    x_p = jnp.zeros((n_p, f_in), x.dtype).at[:n, :].set(x)
    adj_p = jnp.zeros((n_p, n_p), adj.dtype).at[:n, :n].set(adj)
    w_p = jnp.zeros((f_in, f_out_p), weight.dtype).at[:, :f_out].set(weight)
    b_p = jnp.zeros((1, f_out_p), jnp.float32).at[0, :f_out].set(
        bias.astype(jnp.float32))

    # Optional bf16 operands (f32 accumulation inside the kernel) for the
    # v6e/v7x MXU fast path; bias / accumulation / output stay f32.
    x_p = x_p.astype(compute_dtype)
    adj_p = adj_p.astype(compute_dtype)
    w_p = w_p.astype(compute_dtype)

    grid = (n_p // tm,)

    # Resident-VMEM footprint estimate -> explicit scoped-VMEM limit.
    itemsize = jnp.dtype(compute_dtype).itemsize
    vmem_bytes = (
        n_p * f_in * itemsize          # x (resident, fetched once)
        + f_in * f_out_p * itemsize    # W (resident, fetched once)
        + n_p * f_out_p * 4            # support scratch (f32)
        + 2 * tm * n_p * itemsize      # adj row-block (double-buffered)
        + 2 * tm * f_out_p * 4         # output tile (double-buffered)
        + 8 * f_out_p * 4)             # bias tile (padded)
    vmem_limit = max(int(vmem_bytes * 1.3), 32 * 1024 * 1024)

    out_p = pl.pallas_call(
        _fused_gcn_kernel,
        out_shape=jax.ShapeDtypeStruct((n_p, f_out_p), jnp.float32),
        grid_spec=pltpu.PrefetchScalarGridSpec(
            num_scalar_prefetch=0,
            grid=grid,
            in_specs=[
                pl.BlockSpec((n_p, f_in), lambda i: (0, 0)),      # x (whole)
                pl.BlockSpec((f_in, f_out_p), lambda i: (0, 0)),  # W (whole)
                pl.BlockSpec((tm, n_p), lambda i: (i, 0)),        # adj rows
                pl.BlockSpec((1, f_out_p), lambda i: (0, 0)),     # bias (once)
            ],
            out_specs=pl.BlockSpec((tm, f_out_p), lambda i: (i, 0)),
            scratch_shapes=[pltpu.VMEM((n_p, f_out_p), jnp.float32)],
        ),
        # The support scratch is written on grid step 0 and reused by later
        # steps, so the row-block axis must run sequentially on one core.
        compiler_params=pltpu.CompilerParams(
            dimension_semantics=("arbitrary",),
            vmem_limit_bytes=vmem_limit,
        ),
    )(x_p, w_p, adj_p, b_p)

    return out_p[:n, :f_out]


if __name__ == "__main__":
    key = jax.random.PRNGKey(0)
    k_x, k_adj, k_w = jax.random.split(key, 3)

    n_nodes, in_features, out_features = 128, 64, 32

    # Inputs (node features + dense row-normalized adjacency).
    x = jax.random.normal(k_x, (n_nodes, in_features), dtype=jnp.float32)
    adj_raw = (jax.random.uniform(k_adj, (n_nodes, n_nodes)) < 0.1).astype(jnp.float32)
    adj_raw = adj_raw + jnp.eye(n_nodes, dtype=jnp.float32)
    adj = adj_raw / jnp.sum(adj_raw, axis=1, keepdims=True)

    # Parameters: xavier_uniform_ weight, zero bias (deterministic, in-script).
    bound = math.sqrt(6.0 / (in_features + out_features))
    weight = jax.random.uniform(
        k_w, (in_features, out_features), dtype=jnp.float32,
        minval=-bound, maxval=bound)
    bias = jnp.zeros((out_features,), dtype=jnp.float32)

    # Reference (plain JAX, matches the PyTorch forward).
    ref = adj @ (x @ weight) + bias

    # f32 run: exact parity with the module.
    out_f32 = jax.block_until_ready(graph_convolution(x, adj, weight, bias))
    assert out_f32.shape == (n_nodes, out_features)
    assert jnp.allclose(out_f32, ref, atol=1e-4, rtol=1e-4)

    # bf16-operand run (f32 accumulation) — the v6e/v7x MXU fast path.
    out_bf16 = jax.block_until_ready(
        graph_convolution(x, adj, weight, bias, compute_dtype=jnp.bfloat16))
    assert out_bf16.shape == (n_nodes, out_features)
    assert jnp.allclose(out_bf16, ref, atol=1e-1, rtol=1e-1)

    print("KERNEL_OK")
</pallas_src>

<mosaic_0001>
module attributes {stable_mosaic.version = 11 : i64} {
  func.func @_fused_gcn_kernel(%arg0: i32, %arg1: memref<128x64xf32, #tpu.memory_space<vmem>>, %arg2: memref<64x128xf32, #tpu.memory_space<vmem>>, %arg3: memref<128x128xf32, #tpu.memory_space<vmem>>, %arg4: memref<1x128xf32, #tpu.memory_space<vmem>>, %arg5: memref<128x128xf32, #tpu.memory_space<vmem>>, %arg6: memref<128x128xf32, #tpu.memory_space<vmem>>) attributes {dimension_semantics = [#tpu.dimension_semantics<arbitrary>], iteration_bounds = array<i64: 1>, scalar_prefetch = 0 : i64, scratch_operands = 1 : i64, tpu.core_type = #tpu.core_type<tc>, window_params = [{pipeline_mode = #tpu.pipeline_mode<synchronous>, transform_indices = @transform_0, window_bounds = array<i64: 128, 64>}, {pipeline_mode = #tpu.pipeline_mode<synchronous>, transform_indices = @transform_1, window_bounds = array<i64: 64, 128>}, {transform_indices = @transform_2, window_bounds = array<i64: 128, 128>}, {pipeline_mode = #tpu.pipeline_mode<synchronous>, transform_indices = @transform_3, window_bounds = array<i64: 1, 128>}, {transform_indices = @transform_4, window_bounds = array<i64: 128, 128>}]} {
    %c0_i32 = arith.constant 0 : i32
    %0 = arith.cmpi eq, %arg0, %c0_i32 : i32
    %1 = arith.extui %0 : i1 to i32
    %c0_i32_0 = arith.constant 0 : i32
    %2 = arith.cmpi ne, %1, %c0_i32_0 : i32
    scf.if %2 {
      %c0_8 = arith.constant 0 : index
      %c0_9 = arith.constant 0 : index
      %10 = vector.load %arg1[%c0_8, %c0_9] : memref<128x64xf32, #tpu.memory_space<vmem>>, vector<128x64xf32>
      %c0_10 = arith.constant 0 : index
      %c0_11 = arith.constant 0 : index
      %11 = vector.load %arg2[%c0_10, %c0_11] : memref<64x128xf32, #tpu.memory_space<vmem>>, vector<64x128xf32>
      %cst_12 = arith.constant dense<0.000000e+00> : vector<128x128xf32>
      %12 = tpu.matmul %10, %11, %cst_12 {dimension_numbers = #tpu.dot_dimension_numbers<[1], [0], [0], [1], [0, 0, 1, 1], [], []>} : vector<128x64xf32>, vector<64x128xf32>, vector<128x128xf32> -> vector<128x128xf32>
      %c0_13 = arith.constant 0 : index
      %c0_14 = arith.constant 0 : index
      %13 = vector.load %arg6[%c0_13, %c0_14] : memref<128x128xf32, #tpu.memory_space<vmem>>, vector<128x128xf32>
      tpu.vector_store %arg6[%c0_13, %c0_14], %12 {strides = array<i32>} : memref<128x128xf32, #tpu.memory_space<vmem>>, vector<128x128xf32>,
    } else {
    }
    %c0 = arith.constant 0 : index
    %c0_1 = arith.constant 0 : index
    %3 = vector.load %arg3[%c0, %c0_1] : memref<128x128xf32, #tpu.memory_space<vmem>>, vector<128x128xf32>
    %c0_2 = arith.constant 0 : index
    %c0_3 = arith.constant 0 : index
    %4 = vector.load %arg6[%c0_2, %c0_3] : memref<128x128xf32, #tpu.memory_space<vmem>>, vector<128x128xf32>
    %cst = arith.constant dense<0.000000e+00> : vector<128x128xf32>
    %5 = tpu.matmul %3, %4, %cst {dimension_numbers = #tpu.dot_dimension_numbers<[1], [0], [0], [1], [0, 0, 1, 1], [], []>} : vector<128x128xf32>, vector<128x128xf32>, vector<128x128xf32> -> vector<128x128xf32>
    %c0_4 = arith.constant 0 : index
    %c0_5 = arith.constant 0 : index
    %6 = vector.load %arg4[%c0_4, %c0_5] : memref<1x128xf32, #tpu.memory_space<vmem>>, vector<1x128xf32>
    %7 = vector.broadcast %6 : vector<1x128xf32> to vector<128x128xf32>
    %8 = arith.addf %5, %7 : vector<128x128xf32>
    %c0_6 = arith.constant 0 : index
    %c0_7 = arith.constant 0 : index
    %9 = vector.load %arg5[%c0_6, %c0_7] : memref<128x128xf32, #tpu.memory_space<vmem>>, vector<128x128xf32>
    tpu.vector_store %arg5[%c0_6, %c0_7], %8 {strides = array<i32>} : memref<128x128xf32, #tpu.memory_space<vmem>>, vector<128x128xf32>,
    return
  }
  func.func @transform_0(%arg0: i32) -> (i32, i32) {
    %c0_i32 = arith.constant 0 : i32
    %c0_i32_0 = arith.constant 0 : i32
    %c0_i32_1 = arith.constant 0 : i32
    return %c0_i32, %c0_i32_0 : i32, i32
  }
  func.func @transform_1(%arg0: i32) -> (i32, i32) {
    %c0_i32 = arith.constant 0 : i32
    %c0_i32_0 = arith.constant 0 : i32
    %c0_i32_1 = arith.constant 0 : i32
    return %c0_i32, %c0_i32_0 : i32, i32
  }
  func.func @transform_2(%arg0: i32) -> (i32, i32) {
    %c0_i32 = arith.constant 0 : i32
    %c0_i32_0 = arith.constant 0 : i32
    return %arg0, %c0_i32 : i32, i32
  }
  func.func @transform_3(%arg0: i32) -> (i32, i32) {
    %c0_i32 = arith.constant 0 : i32
    %c0_i32_0 = arith.constant 0 : i32
    %c0_i32_1 = arith.constant 0 : i32
    return %c0_i32, %c0_i32_0 : i32, i32
  }
  func.func @transform_4(%arg0: i32) -> (i32, i32) {
    %c0_i32 = arith.constant 0 : i32
    %c0_i32_0 = arith.constant 0 : i32
    return %arg0, %c0_i32 : i32, i32
  }
}

</mosaic_0001>

<bundles_post_ra>
// kernel: tpu_custom_call.1
= control target key start
LH: loop header
LB: loop body
LE: loop exit
PB: predicated region body
PF: predicated region fallthrough
CT: control target
= control target key end

     0   :  { %vm46_vm0 = vcmask 523264   ;;  %s892_s0 = inlined_call_operand.vmem [shape: f32[128,64], index: 0, kind: input, shape index: {}]   ;;  %s893_s1 = inlined_call_operand.vmem [shape: f32[64,128], index: 1, kind: input, shape index: {}]   ;;  %s894_s2 = inlined_call_operand.vmem [shape: f32[128,128], index: 2, kind: input, shape index: {}]   ;;  %s895_s3 = inlined_call_operand.vmem [shape: f32[1,128], index: 3, kind: input, shape index: {}]   ;;  %s896_s4 = inlined_call_operand.hbm [shape: f32[128,128], index: 4, kind: output, shape index: {}]  }
   0x1   :  { %v45_v0 = vld [vmem:[%s893_s1 + $0x38] sm:$0xff]  ;;  %v44_v1 = vld [vmem:[%s893_s1 + $0x30] sm:$0xff]  ;;  %v43_v2 = vld [vmem:[%s893_s1 + $0x28] sm:$0xff] }
   0x2   :  { %545 = vmatprep.subr.mxu0 %v45_v0  ;;  %v22_v3 = vld [vmem:[%s892_s0] sm:$0xff]  ;;  %v41_v5 = vld [vmem:[%s893_s1 + $0x18] sm:$0xff]  ;;  %v40_v6 = vld [vmem:[%s893_s1 + $0x10] sm:$0xff] }
   0x3   :  { %546 = vmatpush3.msra.mxu0 %v45_v0  ;;  %561 = vmatprep.mubr.msk.f32.mxu0 %vm46_vm0, %v22_v3  ;;  %v42_v4 = vld [vmem:[%s893_s1 + $0x20] sm:$0xff] }
   0x4   :  { %547 = vmatprep.subr.mxu0 %v44_v1 }
   0x5   :  { %548 = vmatpush3.msra.mxu0 %v44_v1 }
   0x6   :  { %549 = vmatprep.subr.mxu0 %v43_v2 }
   0x7   :  { %550 = vmatpush3.msra.mxu0 %v43_v2 }
   0x8   :  { %551 = vmatprep.subr.mxu0 %v42_v4 }
   0x9   :  { %552 = vmatpush3.msra.mxu0 %v42_v4 }
   0xa   :  { %9 = vsyncpa [#allocation4], 0  ;;  %553 = vmatprep.subr.mxu0 %v41_v5  ;;  %v39_v7 = vld [vmem:[%s893_s1 + $0x8] sm:$0xff]  ;;  %v38_v8 = vld [vmem:[%s893_s1] sm:$0xff] }
   0xb   :  { %554 = vmatpush3.msra.mxu0 %v41_v5  ;;  %v23_v9 = vld [vmem:[%s892_s0 + $0x8] sm:$0xff]  ;;  %v24_v10 = vld [vmem:[%s892_s0 + $0x10] sm:$0xff]  ;;  %v25_v11 = vld [vmem:[%s892_s0 + $0x18] sm:$0xff] }
   0xc   :  { %555 = vmatprep.subr.mxu0 %v40_v6  ;;  %v26_v12 = vld [vmem:[%s892_s0 + $0x20] sm:$0xff]  ;;  %v27_v13 = vld [vmem:[%s892_s0 + $0x28] sm:$0xff]  ;;  %v28_v14 = vld [vmem:[%s892_s0 + $0x30] sm:$0xff] }
   0xd   :  { %556 = vmatpush3.msra.mxu0 %v40_v6  ;;  %v29_v15 = vld [vmem:[%s892_s0 + $0x38] sm:$0xff]  ;;  %v30_v16 = vld [vmem:[%s892_s0 + $0x40] sm:$0xff]  ;;  %v31_v17 = vld [vmem:[%s892_s0 + $0x48] sm:$0xff] }
   0xe   :  { %557 = vmatprep.subr.mxu0 %v39_v7  ;;  %v32_v18 = vld [vmem:[%s892_s0 + $0x50] sm:$0xff]  ;;  %v33_v19 = vld [vmem:[%s892_s0 + $0x58] sm:$0xff]  ;;  %v34_v20 = vld [vmem:[%s892_s0 + $0x60] sm:$0xff] }
   0xf   :  { %558 = vmatpush3.msra.mxu0 %v39_v7  ;;  %v35_v21 = vld [vmem:[%s892_s0 + $0x68] sm:$0xff]  ;;  %v36_v22 = vld [vmem:[%s892_s0 + $0x70] sm:$0xff]  ;;  %v37_v23 = vld [vmem:[%s892_s0 + $0x78] sm:$0xff] }
  0x10   :  { %559 = vmatprep.subr.mxu0 %v38_v8  ;;  %v260_v24 = vld [vmem:[%s894_s2 + $0x20] sm:$0xff]  ;;  %v261_v42 = vld [vmem:[%s894_s2 + $0x28] sm:$0xff]  ;;  %v262_v44 = vld [vmem:[%s894_s2 + $0x30] sm:$0xff] }
  0x11   :  { %560 = vmatpush3.msra.mxu0 %v38_v8  ;;  %623 = vmatprep.mubr.f32.mxu1 %v260_v24  ;;  %v256_v25 = vld [vmem:[%s894_s2] sm:$0xff]  ;;  %v257_v43 = vld [vmem:[%s894_s2 + $0x8] sm:$0xff]  ;;  %v258_v45 = vld [vmem:[%s894_s2 + $0x10] sm:$0xff] }
  0x12   :  { %562 = vmatmul.mubr.msk.f32.vlgmr.msra.gmra.mxu0 %vm46_vm0, %v23_v9  ;;  %v263_v46 = vld [vmem:[%s894_s2 + $0x38] sm:$0xff]  ;;  %v264_v48 = vld [vmem:[%s894_s2 + $0x40] sm:$0xff]  ;;  %v265_v49 = vld [vmem:[%s894_s2 + $0x48] sm:$0xff] }
  0x13   :  { %564 = vmatprep.mubr.msk.f32.mxu0 %vm46_vm0, %v24_v10  ;;  %v259_v47 = vld [vmem:[%s894_s2 + $0x18] sm:$0xff]  ;;  %v266_v50 = vld [vmem:[%s894_s2 + $0x50] sm:$0xff]  ;;  %v268_v52 = vld [vmem:[%s894_s2 + $0x60] sm:$0xff] }
  0x14   :  { %v267_v51 = vld [vmem:[%s894_s2 + $0x58] sm:$0xff]  ;;  %v269_v53 = vld [vmem:[%s894_s2 + $0x68] sm:$0xff]  ;;  %v270_v54 = vld [vmem:[%s894_s2 + $0x70] sm:$0xff] }
  0x15   :  { %v271_v55 = vld [vmem:[%s894_s2 + $0x78] sm:$0xff]  ;;  %v488_v56 = vld [vmem:[%s895_s3] ss:$0 sm:$0xff]  ;;  %s698_s2 = smov [#allocation3]  }
  0x16   :  { %565 = vmatmul.mubr.msk.f32.gmra.mxu0 %vm46_vm0, %v25_v11  ;;  %s461_s3 = sshll.u32 %s698_s2, 4  ;;  %s462_s3 = int_to_ptr.vmem [resolvable:$true] %s461_s3 }
  0x17   :  { %567 = vmatprep.mubr.msk.f32.mxu0 %vm46_vm0, %v26_v12  ;;  %s676_s14 = scalar_lea.vmem %s462_s3, 2048  ;;  %p681_p1 = scmp.lt.s32.totalorder %s462_s3, %s462_s3 }
  0x18   :  { %p677_p0 = scmp.ne.s32.totalorder %s462_s3, %s676_s14  ;;  %p682_p2 = scmp.lt.s32.totalorder %s676_s14, %s676_s14 }
  0x1a   :  { %568 = vmatmul.mubr.msk.f32.gmra.mxu0 %vm46_vm0, %v27_v13  ;;  %p683_p3 = por %p682_p2, %p681_p1 }
  0x1b   :  { %570 = vmatprep.mubr.msk.f32.mxu0 %vm46_vm0, %v28_v14 }
  0x1c   :  { %p684_p4 = pnand %p683_p3, %p677_p0 }
  0x1e   :  { %571 = vmatmul.mubr.msk.f32.gmra.mxu0 %vm46_vm0, %v29_v15 }
  0x1f   :  { %573 = vmatprep.mubr.msk.f32.mxu0 %vm46_vm0, %v30_v16 }
  0x22   :  { %574 = vmatmul.mubr.msk.f32.gmra.mxu0 %vm46_vm0, %v31_v17 }
  0x23   :  { %576 = vmatprep.mubr.msk.f32.mxu0 %vm46_vm0, %v32_v18 }
  0x26   :  { %577 = vmatmul.mubr.msk.f32.gmra.mxu0 %vm46_vm0, %v33_v19 }
  0x27   :  { %579 = vmatprep.mubr.msk.f32.mxu0 %vm46_vm0, %v34_v20 }
  0x2a   :  { %580 = vmatmul.mubr.msk.f32.gmra.mxu0 %vm46_vm0, %v35_v21 }
  0x2b   :  { %582 = vmatprep.mubr.msk.f32.mxu0 %vm46_vm0, %v36_v22 }
  0x2e   :  { %583 = vmatmul.mubr.msk.f32.gmra.mxu0 %vm46_vm0, %v37_v23 }
  0x2f   :  { %617 = vmatprep.mubr.f32.mxu0 %v256_v25 }
  0xd2   :  { %v820_v26 = vpop.f32.mrf.mxu0 }
  0xd4   :  { %v822_v27 = vpop.f32.mrf.mxu0 }
  0xd6   :  { %v824_v28 = vpop.f32.mrf.mxu0 }
  0xd8   :  { %v826_v29 = vpop.f32.mrf.mxu0 }
  0xda   :  { %v569_v30 = vpop.f32.mrf.mxu0 }
  0xdc   :  { %v181_v31 = vpop.f32.mrf.mxu0 }
  0xde   :  { %v572_v32 = vpop.f32.mrf.mxu0 }
  0xe0   :  { %v191_v33 = vpop.f32.mrf.mxu0 }
  0xe2   :  { %v575_v34 = vpop.f32.mrf.mxu0 }
  0xe4   :  { %v201_v35 = vpop.f32.mrf.mxu0 }
  0xe6   :  { %v578_v36 = vpop.f32.mrf.mxu0 }
  0xe8   :  { %v211_v37 = vpop.f32.mrf.mxu0 }
  0xea   :  { %v581_v38 = vpop.f32.mrf.mxu0 }
  0xec   :  { %v221_v39 = vpop.f32.mrf.mxu0 }
  0xee   :  { %v584_v40 = vpop.f32.mrf.mxu0 }
  0xef   :  { %585 = vmatprep.subr.mxu0 %v584_v40  ;;  %641 = vmatprep.subr.mxu1 %v584_v40 }
  0xf0   :  { %v231_v41 = vpop.f32.mrf.mxu0  ;;  %586 = vmatpush3.msra.mxu0 %v584_v40  ;;  %657 = vmatpush3.msra.mxu1 %v584_v40 }
  0xf1   :  { %587 = vmatprep.subr.mxu0 %v231_v41  ;;  %642 = vmatprep.subr.mxu1 %v231_v41 }
  0xf2   :  { %588 = vmatpush3.msra.mxu0 %v231_v41  ;;  %658 = vmatpush3.msra.mxu1 %v231_v41 }
  0xf3   :  { %589 = vmatprep.subr.mxu0 %v581_v38  ;;  %643 = vmatprep.subr.mxu1 %v581_v38 }
  0xf4   :  { %590 = vmatpush3.msra.mxu0 %v581_v38  ;;  %659 = vmatpush3.msra.mxu1 %v581_v38 }
  0xf5   :  { %591 = vmatprep.subr.mxu0 %v221_v39  ;;  %644 = vmatprep.subr.mxu1 %v221_v39 }
  0xf6   :  { %592 = vmatpush3.msra.mxu0 %v221_v39  ;;  %660 = vmatpush3.msra.mxu1 %v221_v39 }
  0xf7   :  { %593 = vmatprep.subr.mxu0 %v578_v36  ;;  %645 = vmatprep.subr.mxu1 %v578_v36 }
  0xf8   :  { %594 = vmatpush3.msra.mxu0 %v578_v36  ;;  %661 = vmatpush3.msra.mxu1 %v578_v36 }
  0xf9   :  { %595 = vmatprep.subr.mxu0 %v211_v37  ;;  %646 = vmatprep.subr.mxu1 %v211_v37 }
  0xfa   :  { %596 = vmatpush3.msra.mxu0 %v211_v37  ;;  %662 = vmatpush3.msra.mxu1 %v211_v37 }
  0xfb   :  { %597 = vmatprep.subr.mxu0 %v575_v34  ;;  %647 = vmatprep.subr.mxu1 %v575_v34 }
  0xfc   :  { %598 = vmatpush3.msra.mxu0 %v575_v34  ;;  %663 = vmatpush3.msra.mxu1 %v575_v34 }
  0xfd   :  { %599 = vmatprep.subr.mxu0 %v201_v35  ;;  %648 = vmatprep.subr.mxu1 %v201_v35 }
  0xfe   :  { %600 = vmatpush3.msra.mxu0 %v201_v35  ;;  %664 = vmatpush3.msra.mxu1 %v201_v35 }
  0xff   :  { %601 = vmatprep.subr.mxu0 %v572_v32  ;;  %649 = vmatprep.subr.mxu1 %v572_v32 }
 0x100   :  { %602 = vmatpush3.msra.mxu0 %v572_v32  ;;  %665 = vmatpush3.msra.mxu1 %v572_v32 }
 0x101   :  { %603 = vmatprep.subr.mxu0 %v191_v33  ;;  %650 = vmatprep.subr.mxu1 %v191_v33 }
 0x102   :  { %604 = vmatpush3.msra.mxu0 %v191_v33  ;;  %666 = vmatpush3.msra.mxu1 %v191_v33 }
 0x103   :  { %605 = vmatprep.subr.mxu0 %v569_v30  ;;  %651 = vmatprep.subr.mxu1 %v569_v30 }
 0x104   :  { %606 = vmatpush3.msra.mxu0 %v569_v30  ;;  %667 = vmatpush3.msra.mxu1 %v569_v30 }
 0x105   :  { %607 = vmatprep.subr.mxu0 %v181_v31  ;;  %652 = vmatprep.subr.mxu1 %v181_v31 }
 0x106   :  { %608 = vmatpush3.msra.mxu0 %v181_v31  ;;  %668 = vmatpush3.msra.mxu1 %v181_v31 }
 0x107   :  { %609 = vmatprep.subr.mxu0 %v824_v28  ;;  %653 = vmatprep.subr.mxu1 %v824_v28 }
 0x108   :  { %610 = vmatpush3.msra.mxu0 %v824_v28  ;;  %669 = vmatpush3.msra.mxu1 %v824_v28 }
 0x109   :  { %611 = vmatprep.subr.mxu0 %v826_v29  ;;  %654 = vmatprep.subr.mxu1 %v826_v29 }
 0x10a   :  { %612 = vmatpush3.msra.mxu0 %v826_v29  ;;  %670 = vmatpush3.msra.mxu1 %v826_v29 }
 0x10b   :  { %613 = vmatprep.subr.mxu0 %v820_v26  ;;  %655 = vmatprep.subr.mxu1 %v820_v26 }
 0x10c   :  { %614 = vmatpush3.msra.mxu0 %v820_v26  ;;  %671 = vmatpush3.msra.mxu1 %v820_v26 }
 0x10d   :  { %615 = vmatprep.subr.mxu0 %v822_v27  ;;  %656 = vmatprep.subr.mxu1 %v822_v27 }
 0x10e   :  { %616 = vmatpush3.msra.mxu0 %v822_v27  ;;  %672 = vmatpush3.msra.mxu1 %v822_v27 }
 0x10f   :  { %624 = vmatmul.mubr.f32.vlgmr.msra.gmra.mxu1 %v261_v42  ;;  %618 = vmatmul.mubr.f32.vlgmr.msra.gmra.mxu0 %v257_v43 }
 0x110   :  { %626 = vmatprep.mubr.f32.mxu1 %v262_v44  ;;  %620 = vmatprep.mubr.f32.mxu0 %v258_v45 }
 0x113   :  { %627 = vmatmul.mubr.f32.gmra.mxu1 %v263_v46  ;;  %621 = vmatmul.mubr.f32.gmra.mxu0 %v259_v47 }
 0x114   :  { %629 = vmatprep.mubr.f32.mxu1 %v264_v48 }
 0x117   :  { %630 = vmatmul.mubr.f32.gmra.mxu1 %v265_v49 }
 0x118   :  { %632 = vmatprep.mubr.f32.mxu1 %v266_v50 }
 0x11b   :  { %633 = vmatmul.mubr.f32.gmra.mxu1 %v267_v51 }
 0x11c   :  { %635 = vmatprep.mubr.f32.mxu1 %v268_v52 }
 0x11f   :  { %636 = vmatmul.mubr.f32.gmra.mxu1 %v269_v53 }
 0x120   :  { %638 = vmatprep.mubr.f32.mxu1 %v270_v54 }
 0x123   :  { %639 = vmatmul.mubr.f32.gmra.mxu1 %v271_v55 }
 0x1cf   :  { %v625_v57 = vpop.f32.mrf.mxu1  ;;  %v619_v58 = vpop.f32.mrf.mxu0 }
 0x1d0   :  { %v387_v59 = vadd.f32 %v625_v57, %v488_v56  ;;  %v367_v60 = vadd.f32 %v619_v58, %v488_v56 }
 0x1d1   :  { %v381_v61 = vpop.f32.mrf.mxu1  ;;  %v361_v62 = vpop.f32.mrf.mxu0 }
 0x1d2   :  { %445 = vst [vmem:[#allocation3 + $0x28] sm:$0xff] %v387_v59  ;;  %v382_v63 = vadd.f32 %v488_v56, %v381_v61  ;;  %441 = vst [vmem:[#allocation3 + $0x8] sm:$0xff] %v367_v60  ;;  %v362_v0 = vadd.f32 %v488_v56, %v361_v62 }
 0x1d3   :  { %v628_v1 = vpop.f32.mrf.mxu1  ;;  %v622_v2 = vpop.f32.mrf.mxu0 }
 0x1d4   :  { %444 = vst [vmem:[#allocation3 + $0x20] sm:$0xff] %v382_v63  ;;  %v397_v3 = vadd.f32 %v628_v1, %v488_v56  ;;  %440 = vst [vmem:[#allocation3] sm:$0xff] %v362_v0  ;;  %v377_v4 = vadd.f32 %v622_v2, %v488_v56 }
 0x1d5   :  { %v391_v5 = vpop.f32.mrf.mxu1  ;;  %v371_v6 = vpop.f32.mrf.mxu0 }
 0x1d6   :  { %447 = vst [vmem:[#allocation3 + $0x38] sm:$0xff] %v397_v3  ;;  %v392_v7 = vadd.f32 %v488_v56, %v391_v5  ;;  %443 = vst [vmem:[#allocation3 + $0x18] sm:$0xff] %v377_v4  ;;  %v372_v8 = vadd.f32 %v488_v56, %v371_v6 }
 0x1d7   :  { %v631_v9 = vpop.f32.mrf.mxu1 }
 0x1d8   :  { %446 = vst [vmem:[#allocation3 + $0x30] sm:$0xff] %v392_v7  ;;  %v407_v10 = vadd.f32 %v631_v9, %v488_v56  ;;  %442 = vst [vmem:[#allocation3 + $0x10] sm:$0xff] %v372_v8 }
 0x1d9   :  { %v401_v11 = vpop.f32.mrf.mxu1 }
 0x1da   :  { %449 = vst [vmem:[#allocation3 + $0x48] sm:$0xff] %v407_v10  ;;  %v402_v12 = vadd.f32 %v488_v56, %v401_v11 }
 0x1db   :  { %v634_v13 = vpop.f32.mrf.mxu1 }
 0x1dc   :  { %448 = vst [vmem:[#allocation3 + $0x40] sm:$0xff] %v402_v12  ;;  %v417_v14 = vadd.f32 %v634_v13, %v488_v56 }
 0x1dd   :  { %v411_v15 = vpop.f32.mrf.mxu1 }
 0x1de   :  { %451 = vst [vmem:[#allocation3 + $0x58] sm:$0xff] %v417_v14  ;;  %v412_v16 = vadd.f32 %v488_v56, %v411_v15 }
 0x1df   :  { %v637_v17 = vpop.f32.mrf.mxu1 }
 0x1e0   :  { %450 = vst [vmem:[#allocation3 + $0x50] sm:$0xff] %v412_v16  ;;  %v427_v18 = vadd.f32 %v637_v17, %v488_v56 }
 0x1e1   :  { %v421_v19 = vpop.f32.mrf.mxu1 }
 0x1e2   :  { %453 = vst [vmem:[#allocation3 + $0x68] sm:$0xff] %v427_v18  ;;  %v422_v20 = vadd.f32 %v488_v56, %v421_v19 }
 0x1e3   :  { %v640_v21 = vpop.f32.mrf.mxu1 }
 0x1e4   :  { %452 = vst [vmem:[#allocation3 + $0x60] sm:$0xff] %v422_v20  ;;  %v437_v22 = vadd.f32 %v640_v21, %v488_v56 }
 0x1e5   :  { %v431_v23 = vpop.f32.mrf.mxu1 }
 0x1e6   :  { %455 = vst [vmem:[#allocation3 + $0x78] sm:$0xff] %v437_v22  ;;  %v432_v24 = vadd.f32 %v488_v56, %v431_v23 }
 0x1e8   :  { %454 = vst [vmem:[#allocation3 + $0x70] sm:$0xff] %v432_v24 }
 0x1e9   :  { %687 = shalt.err (!%p684_p4)
}
 0x1ea   :  { %s699_s15 = smov 128   ;;  %s700_s16 = smov 8  }
 0x1eb   :  { %467 = dma.vmem_to_hbm [thread:$0]  %s462_s3, 2048, %s896_s4, [#allocation4], %s699_s15, %s699_s15, %s700_s16  }
 0x1ec   :  { %696 = dma.done.wait [#allocation4], 2048  }
 0x1ed   :  { %697 = vsyncadd [#allocation4], 4294965248 }
 0x1ee   :  { %471 = vsyncpa [#allocation4], 1 }

</bundles_post_ra>
